<compile_context>
chip_gen: v5e
topology: v5e:2x2
jax: 0.10.0
libtpu: 0.0.40
codegen_flags: <defaults>
</compile_context>

<pallas_src>
import numpy as np
import jax
import jax.numpy as jnp
from jax import lax
from jax.experimental import pallas as pl
from jax.experimental.pallas import tpu as pltpu

# ----------------------------- configuration --------------------------------
N, C_IN, C_OUT = 2, 4, 8
H = W = 16
NMASKS = 2
STRIDE = 2                    # pool(stride, stride) and shortcut stride
LEVEL = 0.1
EPS = 1e-5
H2, W2 = H // STRIDE, W // STRIDE
P2 = H2 * W2                  # 64 pooled positions per batch element
Q2 = N * P2                   # 128 = lane extent of pooled tensors / the output
R = STRIDE * STRIDE           # 4 pool-window offsets -> four 128-lane blocks

# static selection pattern of the layer-1 grouped conv (groups = C_IN)
_SEL1 = np.zeros((C_OUT, C_IN), np.float32)
for _co in range(C_OUT):
  _SEL1[_co, _co // (C_OUT // C_IN)] = 1.0


# ------------------------------- the kernel ---------------------------------
def perturb_block_kernel(x_ref, n1_ref, n2_ref, w_ref, s_ref, out_ref):
  f32 = jnp.float32
  x = x_ref[...]                        # (NMASKS*C_IN, R*Q2) mask-tiled input
  n1 = n1_ref[...]                      # (NMASKS*C_IN, R*Q2) mask-major, batch-tiled
  n2 = n2_ref[...]                      # (NMASKS*C_OUT, Q2)  mask-major, batch-tiled
  w1 = w_ref[0:C_OUT, :]                # (C_OUT, NMASKS*C_IN) dense grouped conv 1
  ws = w_ref[C_OUT:2 * C_OUT, 0:C_IN]   # (C_OUT, C_IN) shortcut 1x1 conv
  b1, b2 = s_ref[:, 0:1], s_ref[:, 1:2]
  g1, be1 = s_ref[:, 4:5], s_ref[:, 5:6]
  g2, be2 = s_ref[:, 6:7], s_ref[:, 7:8]
  gs, bes = s_ref[:, 8:9], s_ref[:, 9:10]

  def bn(z, gamma, beta):
    # training-mode BatchNorm2d; (N,H,W) is exactly the lane axis here.
    m = jnp.mean(z, axis=1, keepdims=True)
    v = jnp.maximum(jnp.mean(z * z, axis=1, keepdims=True) - m * m, 0.0)
    return (z - m) * lax.rsqrt(v + EPS) * gamma + beta

  # ---- PerturbLayer 1: x + level*noise -> relu -> grouped 1x1 conv as ONE
  #      K=8 MXU matmul over (masks x channels) -> bias -> BN -> relu
  y1 = jnp.maximum(x + LEVEL * n1, 0.0)                        # (8, 512)  VPU
  z1 = jnp.dot(w1, y1, preferred_element_type=f32) + b1        # (8, 512)  MXU
  h1 = jnp.maximum(bn(z1, g1, be1), 0.0)

  # ---- AvgPool2d(2,2): the window offsets are the four tile-aligned lane blocks
  p1 = (h1[:, 0 * Q2:1 * Q2] + h1[:, 1 * Q2:2 * Q2] +
        h1[:, 2 * Q2:3 * Q2] + h1[:, 3 * Q2:4 * Q2]) * (1.0 / R)   # (8, 128)

  # ---- shortcut: stride-2 sampling == window offset r=0 (free slice) + 1x1 conv
  xs = x[0:C_IN, 0:Q2]                                         # (4, 128)
  zs = jnp.dot(ws, xs, preferred_element_type=f32)             # (8, 128)  MXU

  # ---- PerturbLayer 2: grouped conv with groups == channels is diagonal -> VPU only
  z2 = b2
  for m in range(NMASKS):
    y2 = jnp.maximum(p1 + LEVEL * n2[m * C_OUT:(m + 1) * C_OUT, :], 0.0)
    z2 = z2 + s_ref[:, 2 + m:3 + m] * y2
  h2 = jnp.maximum(bn(z2, g2, be2), 0.0)

  # ---- shortcut BN, residual add, final relu; output is one lane-dense vreg
  res = bn(zs, gs, bes)
  out_ref[...] = jnp.maximum(h2 + res, 0.0)


# ------------------------------- wrapper -------------------------------------
def x_layout(x):
  """NCHW -> (NMASKS*C_IN, R*Q2) with lane = r*Q2 + n*P2 + qh*W2 + qw,
  r = (h%2)*2 + (w%2); rows pre-tiled over the noise masks (mask-major)."""
  xr = x.reshape(N, C_IN, H2, STRIDE, W2, STRIDE)
  xr = xr.transpose(1, 3, 5, 0, 2, 4).reshape(C_IN, R * Q2)        # (c, r, n, qh, qw)
  return jnp.broadcast_to(xr[None], (NMASKS, C_IN, R * Q2)).reshape(
      NMASKS * C_IN, R * Q2)


def noise1_layout(noise1):
  """(C_IN, NMASKS, H, W) -> (NMASKS*C_IN, R*Q2), mask-major rows, batch-tiled lanes."""
  nr = noise1.reshape(C_IN, NMASKS, H2, STRIDE, W2, STRIDE)
  nr = nr.transpose(1, 0, 3, 5, 2, 4).reshape(NMASKS * C_IN, R, 1, P2)
  nr = jnp.broadcast_to(nr, (NMASKS * C_IN, R, N, P2))
  return nr.reshape(NMASKS * C_IN, R * Q2)


def noise2_layout(noise2):
  """(C_OUT, NMASKS, H2, W2) -> (NMASKS*C_OUT, Q2), mask-major rows, batch-tiled lanes."""
  nr = noise2.transpose(1, 0, 2, 3).reshape(NMASKS * C_OUT, 1, P2)
  nr = jnp.broadcast_to(nr, (NMASKS * C_OUT, N, P2))
  return nr.reshape(NMASKS * C_OUT, Q2)


def pack_params(p):
  # layer-1 grouped conv expanded per mask to dense (C_OUT, C_IN) slices (jnp only,
  # jit-safe) and concatenated mask-major along K; shortcut conv packed below it.
  w1_cat = jnp.concatenate(
      [jnp.asarray(_SEL1) * p["w1"][:, m][:, None] for m in range(NMASKS)], axis=1)  # (8, 8)
  ws_pad = jnp.pad(p["ws"], ((0, 0), (0, NMASKS * C_IN - C_IN)))                     # (8, 8)
  wpack = jnp.concatenate([w1_cat, ws_pad], axis=0)                                  # (16, 8)
  spack = jnp.stack([p["b1"], p["b2"], p["w2"][:, 0], p["w2"][:, 1],
                     p["g1"], p["be1"], p["g2"], p["be2"], p["gs"], p["bes"]],
                    axis=1)                                                          # (8, 10)
  return wpack, spack


def perturb_basic_block(x, p):
  """x: (N, C_IN, H, W) float32 (NCHW) -> (N, C_OUT, H2, W2) float32."""
  xrep = x_layout(x)
  n1 = noise1_layout(p["noise1"])
  n2 = noise2_layout(p["noise2"])
  wpack, spack = pack_params(p)

  vmem = pl.BlockSpec(memory_space=pltpu.MemorySpace.VMEM)
  out2d = pl.pallas_call(
      perturb_block_kernel,
      out_shape=jax.ShapeDtypeStruct((C_OUT, Q2), jnp.float32),
      in_specs=[vmem] * 5,
      out_specs=vmem,
  )(xrep, n1, n2, wpack, spack)
  # (C_OUT, N*P2) -> NCHW
  return out2d.reshape(C_OUT, N, H2, W2).transpose(1, 0, 2, 3)


# --------------------------- parameter construction -------------------------
def make_params(key):
  ks = jax.random.split(key, 7)
  p = {}
  # PerturbLayer noise masks (uniform(-1,1), unique_masks=True)
  p["noise1"] = jax.random.uniform(ks[0], (C_IN, NMASKS, H, W), minval=-1.0, maxval=1.0)
  p["noise2"] = jax.random.uniform(ks[1], (C_OUT, NMASKS, H2, W2), minval=-1.0, maxval=1.0)
  # grouped 1x1 conv weights/biases (PyTorch weight shape (C_out, nmasks, 1, 1), bias=True)
  p["w1"] = jax.random.normal(ks[2], (C_OUT, NMASKS)) * 0.2
  p["b1"] = jax.random.normal(ks[3], (C_OUT,)) * 0.1
  p["w2"] = jax.random.normal(ks[4], (C_OUT, NMASKS)) * 0.2
  p["b2"] = jax.random.normal(ks[5], (C_OUT,)) * 0.1
  # shortcut 1x1 conv (bias=False)
  p["ws"] = jax.random.normal(ks[6], (C_OUT, C_IN)) * 0.2
  # BatchNorm affine params: PyTorch defaults (gamma=1, beta=0)
  for name in ("1", "2", "s"):
    p["g" + name] = jnp.ones((C_OUT,), jnp.float32)
    p["be" + name] = jnp.zeros((C_OUT,), jnp.float32)
  return p


# ---------------------------- pure-JAX reference -----------------------------
def grouped_dense(w, groups):
  """Grouped-1x1-conv weight (C_out, in_per_group) -> dense (C_out, groups*in_per_group)."""
  c_out, in_pg = w.shape
  out_pg = c_out // groups
  mask = np.zeros((c_out, groups * in_pg), np.float32)
  for co in range(c_out):
    g = co // out_pg
    mask[co, g * in_pg:(g + 1) * in_pg] = 1.0
  return jnp.asarray(mask) * jnp.tile(w, (1, groups))


def reference(x, p):
  def bn_ref(z, gamma, beta):
    m = z.mean(axis=(0, 2, 3), keepdims=True)
    v = ((z - m) ** 2).mean(axis=(0, 2, 3), keepdims=True)
    return (z - m) / jnp.sqrt(v + EPS) * gamma.reshape(1, -1, 1, 1) + beta.reshape(1, -1, 1, 1)

  w1d = grouped_dense(p["w1"], groups=C_IN)
  w2d = grouped_dense(p["w2"], groups=C_OUT)

  # PerturbLayer 1
  y = x[:, :, None, :, :] + LEVEL * p["noise1"][None]
  y = jnp.maximum(y, 0.0).reshape(N, C_IN * NMASKS, H, W)
  z1 = jnp.einsum("ok,nkhw->nohw", w1d, y) + p["b1"][None, :, None, None]
  h1 = jnp.maximum(bn_ref(z1, p["g1"], p["be1"]), 0.0)
  # AvgPool2d(2,2)
  p1 = h1.reshape(N, C_OUT, H2, 2, W2, 2).mean(axis=(3, 5))
  # PerturbLayer 2
  y2 = p1[:, :, None, :, :] + LEVEL * p["noise2"][None]
  y2 = jnp.maximum(y2, 0.0).reshape(N, C_OUT * NMASKS, H2, W2)
  z2 = jnp.einsum("ok,nkhw->nohw", w2d, y2) + p["b2"][None, :, None, None]
  h2 = jnp.maximum(bn_ref(z2, p["g2"], p["be2"]), 0.0)
  # shortcut
  xs = x[:, :, ::STRIDE, ::STRIDE]
  zs = jnp.einsum("oc,nchw->nohw", p["ws"], xs)
  res = bn_ref(zs, p["gs"], p["bes"])
  return jnp.maximum(h2 + res, 0.0)


# ---------------------------------- main -------------------------------------
if __name__ == "__main__":
  key = jax.random.PRNGKey(0)
  kx, kp = jax.random.split(key)
  x = jax.random.normal(kx, (N, C_IN, H, W), dtype=jnp.float32)
  params = make_params(kp)

  out = jax.jit(perturb_basic_block)(x, params)
  out = jax.block_until_ready(out)

  ref = reference(x, params)
  assert out.shape == (N, C_OUT, H2, W2), out.shape
  np.testing.assert_allclose(np.asarray(out), np.asarray(ref), rtol=2e-2, atol=2e-2)

  print("KERNEL_OK")
</pallas_src>

<mosaic_0001>
module attributes {stable_mosaic.version = 11 : i64} {
  func.func @perturb_block_kernel(%arg0: memref<8x512xf32, #tpu.memory_space<vmem>>, %arg1: memref<8x512xf32, #tpu.memory_space<vmem>>, %arg2: memref<16x128xf32, #tpu.memory_space<vmem>>, %arg3: memref<16x8xf32, #tpu.memory_space<vmem>>, %arg4: memref<8x10xf32, #tpu.memory_space<vmem>>, %arg5: memref<8x128xf32, #tpu.memory_space<vmem>>) attributes {dimension_semantics = [], scalar_prefetch = 0 : i64, scratch_operands = 0 : i64, tpu.core_type = #tpu.core_type<tc>} {
    %c0 = arith.constant 0 : index
    %c0_0 = arith.constant 0 : index
    %0 = vector.load %arg0[%c0, %c0_0] : memref<8x512xf32, #tpu.memory_space<vmem>>, vector<8x512xf32>
    %c0_1 = arith.constant 0 : index
    %c0_2 = arith.constant 0 : index
    %1 = vector.load %arg1[%c0_1, %c0_2] : memref<8x512xf32, #tpu.memory_space<vmem>>, vector<8x512xf32>
    %c0_3 = arith.constant 0 : index
    %c0_4 = arith.constant 0 : index
    %2 = vector.load %arg2[%c0_3, %c0_4] : memref<16x128xf32, #tpu.memory_space<vmem>>, vector<16x128xf32>
    %c0_5 = arith.constant 0 : index
    %c0_6 = arith.constant 0 : index
    %3 = vector.load %arg3[%c0_5, %c0_6] : memref<16x8xf32, #tpu.memory_space<vmem>>, vector<8x8xf32>
    %c8 = arith.constant 8 : index
    %c0_7 = arith.constant 0 : index
    %4 = vector.load %arg3[%c8, %c0_7] : memref<16x8xf32, #tpu.memory_space<vmem>>, vector<8x4xf32>
    %c0_8 = arith.constant 0 : index
    %c0_9 = arith.constant 0 : index
    %5 = vector.load %arg4[%c0_8, %c0_9] : memref<8x10xf32, #tpu.memory_space<vmem>>, vector<8x1xf32>
    %c0_10 = arith.constant 0 : index
    %c1 = arith.constant 1 : index
    %6 = vector.load %arg4[%c0_10, %c1] : memref<8x10xf32, #tpu.memory_space<vmem>>, vector<8x1xf32>
    %c0_11 = arith.constant 0 : index
    %c4 = arith.constant 4 : index
    %7 = vector.load %arg4[%c0_11, %c4] : memref<8x10xf32, #tpu.memory_space<vmem>>, vector<8x1xf32>
    %c0_12 = arith.constant 0 : index
    %c5 = arith.constant 5 : index
    %8 = vector.load %arg4[%c0_12, %c5] : memref<8x10xf32, #tpu.memory_space<vmem>>, vector<8x1xf32>
    %c0_13 = arith.constant 0 : index
    %c6 = arith.constant 6 : index
    %9 = vector.load %arg4[%c0_13, %c6] : memref<8x10xf32, #tpu.memory_space<vmem>>, vector<8x1xf32>
    %c0_14 = arith.constant 0 : index
    %c7 = arith.constant 7 : index
    %10 = vector.load %arg4[%c0_14, %c7] : memref<8x10xf32, #tpu.memory_space<vmem>>, vector<8x1xf32>
    %c0_15 = arith.constant 0 : index
    %c8_16 = arith.constant 8 : index
    %11 = vector.load %arg4[%c0_15, %c8_16] : memref<8x10xf32, #tpu.memory_space<vmem>>, vector<8x1xf32>
    %c0_17 = arith.constant 0 : index
    %c9 = arith.constant 9 : index
    %12 = vector.load %arg4[%c0_17, %c9] : memref<8x10xf32, #tpu.memory_space<vmem>>, vector<8x1xf32>
    %cst = arith.constant 1.000000e-01 : f32
    %13 = vector.broadcast %cst : f32 to vector<8x512xf32>
    %14 = arith.mulf %13, %1 : vector<8x512xf32>
    %15 = arith.addf %0, %14 : vector<8x512xf32>
    %cst_18 = arith.constant 0.000000e+00 : f32
    %16 = vector.broadcast %cst_18 : f32 to vector<8x512xf32>
    %17 = arith.maximumf %15, %16 : vector<8x512xf32>
    %cst_19 = arith.constant dense<0.000000e+00> : vector<8x512xf32>
    %18 = tpu.matmul %3, %17, %cst_19 {dimension_numbers = #tpu.dot_dimension_numbers<[1], [0], [0], [1], [0, 0, 1, 1], [], []>} : vector<8x8xf32>, vector<8x512xf32>, vector<8x512xf32> -> vector<8x512xf32>
    %19 = vector.broadcast %5 : vector<8x1xf32> to vector<8x512xf32>
    %20 = arith.addf %18, %19 : vector<8x512xf32>
    %cst_20 = arith.constant dense<0.000000e+00> : vector<8xf32>
    %21 = vector.multi_reduction <add>, %20, %cst_20 [1] : vector<8x512xf32> to vector<8xf32>
    %22 = vector.shape_cast %21 : vector<8xf32> to vector<8x1xf32>
    %cst_21 = arith.constant 5.120000e+02 : f32
    %23 = vector.broadcast %cst_21 : f32 to vector<8x1xf32>
    %24 = arith.divf %22, %23 : vector<8x1xf32>
    %25 = arith.mulf %20, %20 : vector<8x512xf32>
    %cst_22 = arith.constant dense<0.000000e+00> : vector<8xf32>
    %26 = vector.multi_reduction <add>, %25, %cst_22 [1] : vector<8x512xf32> to vector<8xf32>
    %27 = vector.shape_cast %26 : vector<8xf32> to vector<8x1xf32>
    %cst_23 = arith.constant 5.120000e+02 : f32
    %28 = vector.broadcast %cst_23 : f32 to vector<8x1xf32>
    %29 = arith.divf %27, %28 : vector<8x1xf32>
    %30 = arith.mulf %24, %24 : vector<8x1xf32>
    %31 = arith.subf %29, %30 : vector<8x1xf32>
    %cst_24 = arith.constant 0.000000e+00 : f32
    %32 = vector.broadcast %cst_24 : f32 to vector<8x1xf32>
    %33 = arith.maximumf %31, %32 : vector<8x1xf32>
    %34 = vector.broadcast %24 : vector<8x1xf32> to vector<8x512xf32>
    %35 = arith.subf %20, %34 : vector<8x512xf32>
    %cst_25 = arith.constant 9.99999974E-6 : f32
    %36 = vector.broadcast %cst_25 : f32 to vector<8x1xf32>
    %37 = arith.addf %33, %36 : vector<8x1xf32>
    %38 = math.rsqrt %37 : vector<8x1xf32>
    %39 = vector.broadcast %38 : vector<8x1xf32> to vector<8x512xf32>
    %40 = arith.mulf %35, %39 : vector<8x512xf32>
    %41 = vector.broadcast %7 : vector<8x1xf32> to vector<8x512xf32>
    %42 = arith.mulf %40, %41 : vector<8x512xf32>
    %43 = vector.broadcast %8 : vector<8x1xf32> to vector<8x512xf32>
    %44 = arith.addf %42, %43 : vector<8x512xf32>
    %cst_26 = arith.constant 0.000000e+00 : f32
    %45 = vector.broadcast %cst_26 : f32 to vector<8x512xf32>
    %46 = arith.maximumf %44, %45 : vector<8x512xf32>
    %47 = vector.extract_strided_slice %46 {offsets = [0, 0], sizes = [8, 128], strides = [1, 1]} : vector<8x512xf32> to vector<8x128xf32>
    %48 = vector.extract_strided_slice %46 {offsets = [0, 128], sizes = [8, 128], strides = [1, 1]} : vector<8x512xf32> to vector<8x128xf32>
    %49 = arith.addf %47, %48 : vector<8x128xf32>
    %50 = vector.extract_strided_slice %46 {offsets = [0, 256], sizes = [8, 128], strides = [1, 1]} : vector<8x512xf32> to vector<8x128xf32>
    %51 = arith.addf %49, %50 : vector<8x128xf32>
    %52 = vector.extract_strided_slice %46 {offsets = [0, 384], sizes = [8, 128], strides = [1, 1]} : vector<8x512xf32> to vector<8x128xf32>
    %53 = arith.addf %51, %52 : vector<8x128xf32>
    %cst_27 = arith.constant 2.500000e-01 : f32
    %54 = vector.broadcast %cst_27 : f32 to vector<8x128xf32>
    %55 = arith.mulf %53, %54 : vector<8x128xf32>
    %56 = vector.extract_strided_slice %0 {offsets = [0, 0], sizes = [4, 128], strides = [1, 1]} : vector<8x512xf32> to vector<4x128xf32>
    %cst_28 = arith.constant dense<0.000000e+00> : vector<8x128xf32>
    %57 = tpu.matmul %4, %56, %cst_28 {dimension_numbers = #tpu.dot_dimension_numbers<[1], [0], [0], [1], [0, 0, 1, 1], [], []>} : vector<8x4xf32>, vector<4x128xf32>, vector<8x128xf32> -> vector<8x128xf32>
    %58 = vector.extract_strided_slice %2 {offsets = [0, 0], sizes = [8, 128], strides = [1, 1]} : vector<16x128xf32> to vector<8x128xf32>
    %cst_29 = arith.constant 1.000000e-01 : f32
    %59 = vector.broadcast %cst_29 : f32 to vector<8x128xf32>
    %60 = arith.mulf %59, %58 : vector<8x128xf32>
    %61 = arith.addf %55, %60 : vector<8x128xf32>
    %cst_30 = arith.constant 0.000000e+00 : f32
    %62 = vector.broadcast %cst_30 : f32 to vector<8x128xf32>
    %63 = arith.maximumf %61, %62 : vector<8x128xf32>
    %c0_31 = arith.constant 0 : index
    %c2 = arith.constant 2 : index
    %64 = vector.load %arg4[%c0_31, %c2] : memref<8x10xf32, #tpu.memory_space<vmem>>, vector<8x1xf32>
    %65 = vector.broadcast %64 : vector<8x1xf32> to vector<8x128xf32>
    %66 = arith.mulf %65, %63 : vector<8x128xf32>
    %67 = vector.broadcast %6 : vector<8x1xf32> to vector<8x128xf32>
    %68 = arith.addf %67, %66 : vector<8x128xf32>
    %69 = vector.extract_strided_slice %2 {offsets = [8, 0], sizes = [8, 128], strides = [1, 1]} : vector<16x128xf32> to vector<8x128xf32>
    %cst_32 = arith.constant 1.000000e-01 : f32
    %70 = vector.broadcast %cst_32 : f32 to vector<8x128xf32>
    %71 = arith.mulf %70, %69 : vector<8x128xf32>
    %72 = arith.addf %55, %71 : vector<8x128xf32>
    %cst_33 = arith.constant 0.000000e+00 : f32
    %73 = vector.broadcast %cst_33 : f32 to vector<8x128xf32>
    %74 = arith.maximumf %72, %73 : vector<8x128xf32>
    %c0_34 = arith.constant 0 : index
    %c3 = arith.constant 3 : index
    %75 = vector.load %arg4[%c0_34, %c3] : memref<8x10xf32, #tpu.memory_space<vmem>>, vector<8x1xf32>
    %76 = vector.broadcast %75 : vector<8x1xf32> to vector<8x128xf32>
    %77 = arith.mulf %76, %74 : vector<8x128xf32>
    %78 = arith.addf %68, %77 : vector<8x128xf32>
    %cst_35 = arith.constant dense<0.000000e+00> : vector<8xf32>
    %79 = vector.multi_reduction <add>, %78, %cst_35 [1] : vector<8x128xf32> to vector<8xf32>
    %80 = vector.shape_cast %79 : vector<8xf32> to vector<8x1xf32>
    %cst_36 = arith.constant 1.280000e+02 : f32
    %81 = vector.broadcast %cst_36 : f32 to vector<8x1xf32>
    %82 = arith.divf %80, %81 : vector<8x1xf32>
    %83 = arith.mulf %78, %78 : vector<8x128xf32>
    %cst_37 = arith.constant dense<0.000000e+00> : vector<8xf32>
    %84 = vector.multi_reduction <add>, %83, %cst_37 [1] : vector<8x128xf32> to vector<8xf32>
    %85 = vector.shape_cast %84 : vector<8xf32> to vector<8x1xf32>
    %cst_38 = arith.constant 1.280000e+02 : f32
    %86 = vector.broadcast %cst_38 : f32 to vector<8x1xf32>
    %87 = arith.divf %85, %86 : vector<8x1xf32>
    %88 = arith.mulf %82, %82 : vector<8x1xf32>
    %89 = arith.subf %87, %88 : vector<8x1xf32>
    %cst_39 = arith.constant 0.000000e+00 : f32
    %90 = vector.broadcast %cst_39 : f32 to vector<8x1xf32>
    %91 = arith.maximumf %89, %90 : vector<8x1xf32>
    %92 = vector.broadcast %82 : vector<8x1xf32> to vector<8x128xf32>
    %93 = arith.subf %78, %92 : vector<8x128xf32>
    %cst_40 = arith.constant 9.99999974E-6 : f32
    %94 = vector.broadcast %cst_40 : f32 to vector<8x1xf32>
    %95 = arith.addf %91, %94 : vector<8x1xf32>
    %96 = math.rsqrt %95 : vector<8x1xf32>
    %97 = vector.broadcast %96 : vector<8x1xf32> to vector<8x128xf32>
    %98 = arith.mulf %93, %97 : vector<8x128xf32>
    %99 = vector.broadcast %9 : vector<8x1xf32> to vector<8x128xf32>
    %100 = arith.mulf %98, %99 : vector<8x128xf32>
    %101 = vector.broadcast %10 : vector<8x1xf32> to vector<8x128xf32>
    %102 = arith.addf %100, %101 : vector<8x128xf32>
    %cst_41 = arith.constant 0.000000e+00 : f32
    %103 = vector.broadcast %cst_41 : f32 to vector<8x128xf32>
    %104 = arith.maximumf %102, %103 : vector<8x128xf32>
    %cst_42 = arith.constant dense<0.000000e+00> : vector<8xf32>
    %105 = vector.multi_reduction <add>, %57, %cst_42 [1] : vector<8x128xf32> to vector<8xf32>
    %106 = vector.shape_cast %105 : vector<8xf32> to vector<8x1xf32>
    %cst_43 = arith.constant 1.280000e+02 : f32
    %107 = vector.broadcast %cst_43 : f32 to vector<8x1xf32>
    %108 = arith.divf %106, %107 : vector<8x1xf32>
    %109 = arith.mulf %57, %57 : vector<8x128xf32>
    %cst_44 = arith.constant dense<0.000000e+00> : vector<8xf32>
    %110 = vector.multi_reduction <add>, %109, %cst_44 [1] : vector<8x128xf32> to vector<8xf32>
    %111 = vector.shape_cast %110 : vector<8xf32> to vector<8x1xf32>
    %cst_45 = arith.constant 1.280000e+02 : f32
    %112 = vector.broadcast %cst_45 : f32 to vector<8x1xf32>
    %113 = arith.divf %111, %112 : vector<8x1xf32>
    %114 = arith.mulf %108, %108 : vector<8x1xf32>
    %115 = arith.subf %113, %114 : vector<8x1xf32>
    %cst_46 = arith.constant 0.000000e+00 : f32
    %116 = vector.broadcast %cst_46 : f32 to vector<8x1xf32>
    %117 = arith.maximumf %115, %116 : vector<8x1xf32>
    %118 = vector.broadcast %108 : vector<8x1xf32> to vector<8x128xf32>
    %119 = arith.subf %57, %118 : vector<8x128xf32>
    %cst_47 = arith.constant 9.99999974E-6 : f32
    %120 = vector.broadcast %cst_47 : f32 to vector<8x1xf32>
    %121 = arith.addf %117, %120 : vector<8x1xf32>
    %122 = math.rsqrt %121 : vector<8x1xf32>
    %123 = vector.broadcast %122 : vector<8x1xf32> to vector<8x128xf32>
    %124 = arith.mulf %119, %123 : vector<8x128xf32>
    %125 = vector.broadcast %11 : vector<8x1xf32> to vector<8x128xf32>
    %126 = arith.mulf %124, %125 : vector<8x128xf32>
    %127 = vector.broadcast %12 : vector<8x1xf32> to vector<8x128xf32>
    %128 = arith.addf %126, %127 : vector<8x128xf32>
    %129 = arith.addf %104, %128 : vector<8x128xf32>
    %cst_48 = arith.constant 0.000000e+00 : f32
    %130 = vector.broadcast %cst_48 : f32 to vector<8x128xf32>
    %131 = arith.maximumf %129, %130 : vector<8x128xf32>
    %c0_49 = arith.constant 0 : index
    %c0_50 = arith.constant 0 : index
    %132 = vector.load %arg5[%c0_49, %c0_50] : memref<8x128xf32, #tpu.memory_space<vmem>>, vector<8x128xf32>
    tpu.vector_store %arg5[%c0_49, %c0_50], %131 {strides = array<i32>} : memref<8x128xf32, #tpu.memory_space<vmem>>, vector<8x128xf32>,
    return
  }
}

</mosaic_0001>

<bundles_post_ra>
// kernel: perturb_basic_block.1
= control target key start
LH: loop header
LB: loop body
LE: loop exit
PB: predicated region body
PF: predicated region fallthrough
CT: control target
= control target key end

     0   :  { %v373_v2 = vmov 0   ;;  %vm50_vm0 = vcmask 64512   ;;  %vm207_vm1 = vcmask 1043456   ;;  %vm203_vm2 = vcmask 31744   ;;  %s499_s0 = inlined_call_operand.vmem [shape: f32[8,512], index: 0, kind: input, shape index: {}]   ;;  %s500_s1 = inlined_call_operand.vmem [shape: f32[8,512], index: 1, kind: input, shape index: {}]   ;;  %s501_s4 = inlined_call_operand.vmem [shape: f32[8,10], index: 4, kind: input, shape index: {}]   ;;  %s502_s3 = inlined_call_operand.vmem [shape: f32[16,8], index: 3, kind: input, shape index: {}]   ;;  %s503_s2 = inlined_call_operand.vmem [shape: f32[16,128], index: 2, kind: input, shape index: {}]   ;;  %s504_s5 = inlined_call_operand.vmem [shape: f32[8,128], index: 5, kind: output, shape index: {}]  }
   0x1   :  { %v22_v0 = vld [vmem:[%s499_s0 + $0x10] sm:$0xff]  ;;  %352 = vset.pattern.permute.xlu0 %v373_v2  ;;  %v23_v4 = vld [vmem:[%s499_s0 + $0x18] sm:$0xff]  ;;  %v20_v6 = vld [vmem:[%s499_s0] sm:$0xff]  ;;  %v374_v24 = vmov 4   ;;  %v375_v40 = vmov 5   ;;  %v376_v46 = vmov 2  }
   0x2   :  { %v26_v1 = vld [vmem:[%s500_s1 + $0x10] sm:$0xff]  ;;  %v27_v5 = vld [vmem:[%s500_s1 + $0x18] sm:$0xff]  ;;  %v24_v8 = vld [vmem:[%s500_s1] sm:$0xff]  ;;  %353 = vset.pattern.permute.xlu1 %v374_v24  ;;  %354 = vset.pattern.permute.xlu2 %v375_v40  ;;  %v377_v48 = vmov 1   ;;  %v378_v49 = vmov 3   ;;  %v379_v50 = vmov 512.0  }
   0x3   :  { %v35_v3 = vmul.f32 0.1, %v26_v1  ;;  %v36_v7 = vmul.f32 0.1, %v27_v5  ;;  %v21_v9 = vld [vmem:[%s499_s0 + $0x8] sm:$0xff]  ;;  %v442_v14 = vld [vmem:[%s501_s4] sm:$0xff]  ;;  %363 = vrcp.f32 %v379_v50 }
   0x4   :  { %v25_v10 = vld [vmem:[%s500_s1 + $0x8] sm:$0xff]  ;;  %v33_v12 = vmul.f32 0.1, %v24_v8  ;;  %47 = vperm.xlu0 %352, %v442_v14   ;;  %v30_v17 = vld [vmem:[%s502_s3] sm:$0xff]  ;;  %188 = vperm.xlu2 %354, %v442_v14   ;;  %v380_v53 = vmov 7  }
   0x5   :  { %v39_v11 = vadd.f32 %v35_v3, %v22_v0  ;;  %v34_v13 = vmul.f32 0.1, %v25_v10  ;;  %v40_v15 = vadd.f32 %v36_v7, %v23_v4  ;;  %v31_v23 = vld [vmem:[%s502_s3 + $0x8] sm:$0xff] }
   0x6   :  { %v37_v18 = vadd.f32 %v33_v12, %v20_v6 }
   0x7   :  { %v43_v16 = vmax.f32 %v39_v11, 0.0  ;;  %v38_v19 = vadd.f32 %v34_v13, %v21_v9  ;;  %v44_v20 = vmax.f32 %v40_v15, 0.0  ;;  %v381_v9 = vmov 8  }
   0x8   :  { %v41_v21 = vmax.f32 %v37_v18, 0.0 }
   0x9   :  { %109 = vmatpush.msra.mxu2 %v43_v16  ;;  %v42_v22 = vmax.f32 %v38_v19, 0.0  ;;  %129 = vmatpush.msra.mxu3 %v44_v20  ;;  %v364_v51 = vpop.eup %363 }
   0xa   :  { %336 = vmatmul.msk.f32.vlgmr.msra.gmra.mxu2 %vm50_vm0, %v30_v17  ;;  %337 = vmatmul.msk.f32.vlgmr.msra.gmra.mxu3 %vm50_vm0, %v30_v17  ;;  %v140_v52 = vmul.f32 512.0, %v364_v51  ;;  %vm144_vm3 = vweird.f32 %v364_v51 }
   0xb   :  { %69 = vmatpush.msra.mxu0 %v41_v21  ;;  %89 = vmatpush.msra.mxu1 %v42_v22 }
   0xc   :  { %334 = vmatmul.msk.f32.vlgmr.msra.gmra.mxu0 %vm50_vm0, %v30_v17  ;;  %335 = vmatmul.msk.f32.vlgmr.msra.gmra.mxu1 %vm50_vm0, %v30_v17  ;;  %v141_v54 = vsub.f32 1.0, %v140_v52  ;;  %v382_v52 = vmov 6  }
   0xd   :  { %338 = vmatpush.msk.msrb.mxu0 %vm207_vm1, %v20_v6  ;;  %355 = vset.pattern.permute.xlu2 %v376_v46 }
   0xe   :  { %235 = vperm.xlu2 %355, %v442_v14   ;;  %v142_v55 = vmul.f32 %v364_v51, %v141_v54  ;;  %358 = vset.pattern.permute.xlu0 %v382_v52 }
  0x10   :  { %v143_v56 = vadd.f32 %v364_v51, %v142_v55 }
  0x12   :  { %v145_v57 = vsel %vm144_vm3, %v364_v51, %v143_v56  ;;  %v384_v56 = vmov 128.0  }
  0x14   :  { %339 = vmatmul.msk.f32.vlgmr.msrb.gmra.mxu0 %vm203_vm2, %v31_v23 }
  0x16   :  { %356 = vset.pattern.permute.xlu2 %v377_v48 }
  0x17   :  { %240 = vperm.xlu2 %356, %v442_v14  }
  0x1f   :  { %357 = vset.pattern.permute.xlu2 %v378_v49 }
  0x20   :  { %248 = vperm.xlu2 %357, %v442_v14  }
  0x28   :  { %359 = vset.pattern.permute.xlu2 %v380_v53  ;;  %v383_v53 = vmov 9  }
  0x29   :  { %289 = vperm.xlu2 %359, %v442_v14  }
  0x31   :  { %361 = vset.pattern.permute.xlu2 %v383_v53 }
  0x5e   :  { %v189_v4 = vpop.permute.xlu2 %188 }
  0x68   :  { %v236_v17 = vpop.permute.xlu2 %235 }
  0x76   :  { %v48_v25 = vpop.permute.xlu0 %47 }
  0x89   :  { %v71_v26 = vpop.f32.mrf.mxu0  ;;  %v91_v28 = vpop.f32.mrf.mxu1 }
  0x8a   :  { %v451_v27 = vadd.f32 %v71_v26, %v48_v25  ;;  %v453_v29 = vadd.f32 %v91_v28, %v48_v25 }
  0x8c   :  { %v147_v30 = vmul.f32 %v451_v27, %v451_v27  ;;  %v134_v31 = vadd.f32 %v453_v29, %v451_v27  ;;  %v148_v32 = vmul.f32 %v453_v29, %v453_v29 }
  0x8d   :  { %v111_v33 = vpop.f32.mrf.mxu2  ;;  %v131_v35 = vpop.f32.mrf.mxu3 }
  0x8e   :  { %v461_v34 = vadd.f32 %v111_v33, %v48_v25  ;;  %v463_v36 = vadd.f32 %v131_v35, %v48_v25  ;;  %v151_v37 = vadd.f32 %v148_v32, %v147_v30  ;;  %v241_v35 = vpop.permute.xlu2 %240 }
  0x90   :  { %v135_v38 = vadd.f32 %v134_v31, %v461_v34  ;;  %v149_v39 = vmul.f32 %v461_v34, %v461_v34  ;;  %v150_v42 = vmul.f32 %v463_v36, %v463_v36 }
  0x91   :  { %v472_v45 = vpop.f32.mrf.mxu0 }
  0x92   :  { %v136_v41 = vadd.f32 %v135_v38, %v463_v36  ;;  %v152_v43 = vadd.f32 %v151_v37, %v149_v39  ;;  %v297_v47 = vmul.f32 %v472_v45, %v472_v45 }
  0x94   :  { %137 = vadd.xlane.f32.xlu0 %v136_v41  ;;  %v153_v44 = vadd.f32 %v152_v43, %v150_v42 }
  0x96   :  { %154 = vadd.xlane.f32.xlu1 %v153_v44  ;;  %v249_v48 = vpop.permute.xlu2 %248 }
  0x9c   :  { %294 = vadd.xlane.f32.xlu0 %v472_v45 }
  0xa4   :  { %298 = vadd.xlane.f32.xlu0 %v297_v47 }
  0xaf   :  { %180 = vperm.xlu1 %353, %v442_v14  }
  0xb7   :  { %360 = vset.pattern.permute.xlu1 %v381_v9 }
  0xb8   :  { %284 = vperm.xlu0 %358, %v442_v14  }
  0xc0   :  { %362 = vset.pattern.permute.xlu0 %v383_v53 }
 0x107   :  { %v138_v58 = vpop.xlane.xlu0 %137 }
 0x108   :  { %v146_v59 = vmul.f32 %v145_v57, %v138_v58 }
 0x109   :  { %v155_v60 = vpop.xlane.xlu1 %154 }
 0x10a   :  { %v156_v61 = vmul.f32 %v155_v60, %v145_v57  ;;  %v157_v62 = vmul.f32 %v146_v59, %v146_v59  ;;  %v160_v10 = vsub.f32 %v451_v27, %v146_v59  ;;  %v161_v11 = vsub.f32 %v453_v29, %v146_v59 }
 0x10b   :  { %v162_v12 = vsub.f32 %v461_v34, %v146_v59  ;;  %v163_v13 = vsub.f32 %v463_v36, %v146_v59  ;;  %v28_v34 = vld [vmem:[%s503_s2] sm:$0xff]  ;;  %v29_v36 = vld [vmem:[%s503_s2 + $0x8] sm:$0xff] }
 0x10c   :  { %v158_v63 = vsub.f32 %v156_v61, %v157_v62  ;;  %v231_v40 = vmul.f32 0.1, %v28_v34  ;;  %v244_v41 = vmul.f32 0.1, %v29_v36 }
 0x10e   :  { %v159_v0 = vmax.f32 %v158_v63, 0.0 }
 0x10f   :  { %v295_v61 = vpop.xlane.xlu0 %294 }
 0x110   :  { %v164_v1 = vadd.f32 1e-05, %v159_v0 }
 0x112   :  { %365 = vrsqrt.f32 %v164_v1  ;;  %vm171_vm5 = vweird.f32 %v164_v1 }
 0x113   :  { %367 = vrcp.f32 %v384_v56 }
 0x118   :  { %v366_v2 = vpop.eup %365 }
 0x119   :  { %v166_v3 = vmul.f32 %v366_v2, %v164_v1  ;;  %vm172_vm4 = vweird.f32 %v366_v2  ;;  %v368_v57 = vpop.eup %367  ;;  %v299_v1 = vpop.xlane.xlu0 %298 }
 0x11a   :  { %vm173_vm6 = vmor %vm171_vm5, %vm172_vm4  ;;  %v256_v58 = vmul.f32 128.0, %v368_v57  ;;  %vm260_vm7 = vweird.f32 %v368_v57 }
 0x11b   :  { %v167_v5 = vmul.f32 %v366_v2, %v166_v3 }
 0x11c   :  { %v257_v59 = vsub.f32 1.0, %v256_v58 }
 0x11d   :  { %v168_v6 = vmul.f32 0.5, %v167_v5 }
 0x11e   :  { %v258_v60 = vmul.f32 %v368_v57, %v257_v59 }
 0x11f   :  { %v169_v7 = vsub.f32 1.5, %v168_v6  ;;  %v290_v6 = vpop.permute.xlu2 %289 }
 0x120   :  { %v259_v62 = vadd.f32 %v368_v57, %v258_v60 }
 0x121   :  { %v170_v8 = vmul.f32 %v366_v2, %v169_v7  ;;  %v181_v16 = vpop.permute.xlu1 %180 }
 0x122   :  { %v261_v63 = vsel %vm260_vm7, %v368_v57, %v259_v62 }
 0x123   :  { %v174_v15 = vsel %vm173_vm6, %v366_v2, %v170_v8  ;;  %v296_v0 = vmul.f32 %v295_v61, %v261_v63  ;;  %v300_v3 = vmul.f32 %v299_v1, %v261_v63 }
 0x124   :  { %v175_v18 = vmul.f32 %v174_v15, %v160_v10  ;;  %v176_v19 = vmul.f32 %v174_v15, %v161_v11  ;;  %v177_v20 = vmul.f32 %v174_v15, %v162_v12  ;;  %v178_v21 = vmul.f32 %v174_v15, %v163_v13 }
 0x125   :  { %v301_v2 = vmul.f32 %v296_v0, %v296_v0 }
 0x126   :  { %v183_v22 = vmul.f32 %v181_v16, %v175_v18  ;;  %v184_v23 = vmul.f32 %v181_v16, %v176_v19  ;;  %v185_v24 = vmul.f32 %v181_v16, %v177_v20  ;;  %v186_v25 = vmul.f32 %v181_v16, %v178_v21 }
 0x128   :  { %v191_v26 = vadd.f32 %v189_v4, %v183_v22  ;;  %v192_v28 = vadd.f32 %v189_v4, %v184_v23  ;;  %v193_v27 = vadd.f32 %v189_v4, %v185_v24  ;;  %v194_v30 = vadd.f32 %v189_v4, %v186_v25 }
 0x129   :  { %v302_v4 = vsub.f32 %v300_v3, %v301_v2 }
 0x12a   :  { %v195_v29 = vmax.f32 %v191_v26, 0.0  ;;  %v196_v31 = vmax.f32 %v192_v28, 0.0  ;;  %v197_v32 = vmax.f32 %v193_v27, 0.0  ;;  %v198_v37 = vmax.f32 %v194_v30, 0.0 }
 0x12b   :  { %v303_v5 = vmax.f32 %v302_v4, 0.0  ;;  %v304_v28 = vsub.f32 %v472_v45, %v296_v0 }
 0x12c   :  { %v199_v33 = vadd.f32 %v196_v31, %v195_v29 }
 0x12d   :  { %v305_v7 = vadd.f32 1e-05, %v303_v5 }
 0x12e   :  { %v200_v38 = vadd.f32 %v199_v33, %v197_v32  ;;  %v285_v33 = vpop.permute.xlu0 %284 }
 0x12f   :  { %369 = vrsqrt.f32 %v305_v7  ;;  %vm312_vm8 = vweird.f32 %v305_v7 }
 0x130   :  { %v201_v39 = vadd.f32 %v200_v38, %v198_v37 }
 0x132   :  { %v202_v42 = vmul.f32 0.25, %v201_v39 }
 0x134   :  { %v232_v43 = vadd.f32 %v231_v40, %v202_v42  ;;  %v245_v44 = vadd.f32 %v244_v41, %v202_v42 }
 0x135   :  { %v370_v10 = vpop.eup %369 }
 0x136   :  { %v233_v46 = vmax.f32 %v232_v43, 0.0  ;;  %v246_v47 = vmax.f32 %v245_v44, 0.0  ;;  %v307_v15 = vmul.f32 %v370_v10, %v305_v7  ;;  %vm313_vm9 = vweird.f32 %v370_v10 }
 0x137   :  { %vm314_vm10 = vmor %vm312_vm8, %vm313_vm9 }
 0x138   :  { %v238_v49 = vmul.f32 %v236_v17, %v233_v46  ;;  %v251_v51 = vmul.f32 %v249_v48, %v246_v47  ;;  %v308_v18 = vmul.f32 %v370_v10, %v307_v15 }
 0x13a   :  { %v243_v50 = vadd.f32 %v241_v35, %v238_v49  ;;  %v309_v19 = vmul.f32 0.5, %v308_v18 }
 0x13c   :  { %v252_v54 = vadd.f32 %v251_v51, %v243_v50  ;;  %v310_v22 = vsub.f32 1.5, %v309_v19 }
 0x13e   :  { %253 = vadd.xlane.f32.xlu2 %v252_v54  ;;  %v263_v55 = vmul.f32 %v252_v54, %v252_v54  ;;  %v311_v24 = vmul.f32 %v370_v10, %v310_v22 }
 0x140   :  { %264 = vadd.xlane.f32.xlu1 %v263_v55  ;;  %v315_v27 = vsel %vm314_vm10, %v370_v10, %v311_v24 }
 0x141   :  { %v316_v34 = vmul.f32 %v315_v27, %v304_v28 }
 0x156   :  { %323 = vperm.xlu2 %361, %v442_v14  }
 0x159   :  { %318 = vperm.xlu1 %360, %v442_v14  }
 0x1b1   :  { %v254_v14 = vpop.xlane.xlu2 %253 }
 0x1b2   :  { %v262_v8 = vmul.f32 %v261_v63, %v254_v14 }
 0x1b3   :  { %v265_v9 = vpop.xlane.xlu1 %264 }
 0x1b4   :  { %v267_v11 = vmul.f32 %v262_v8, %v262_v8  ;;  %v266_v12 = vmul.f32 %v265_v9, %v261_v63  ;;  %v270_v29 = vsub.f32 %v252_v54, %v262_v8 }
 0x1b6   :  { %v268_v13 = vsub.f32 %v266_v12, %v267_v11 }
 0x1b8   :  { %v269_v16 = vmax.f32 %v268_v13, 0.0 }
 0x1b9   :  { %v324_v38 = vpop.permute.xlu2 %323 }
 0x1ba   :  { %v271_v17 = vadd.f32 1e-05, %v269_v16 }
 0x1bc   :  { %371 = vrsqrt.f32 %v271_v17  ;;  %vm278_vm12 = vweird.f32 %v271_v17 }
 0x1c2   :  { %v372_v20 = vpop.eup %371 }
 0x1c3   :  { %v273_v21 = vmul.f32 %v372_v20, %v271_v17  ;;  %vm279_vm11 = vweird.f32 %v372_v20 }
 0x1c4   :  { %vm280_vm13 = vmor %vm278_vm12, %vm279_vm11 }
 0x1c5   :  { %v274_v23 = vmul.f32 %v372_v20, %v273_v21 }
 0x1c7   :  { %v275_v25 = vmul.f32 0.5, %v274_v23 }
 0x1c9   :  { %v276_v26 = vsub.f32 1.5, %v275_v25 }
 0x1cb   :  { %v277_v30 = vmul.f32 %v372_v20, %v276_v26  ;;  %v319_v31 = vpop.permute.xlu1 %318 }
 0x1cc   :  { %v321_v36 = vmul.f32 %v319_v31, %v316_v34 }
 0x1cd   :  { %v281_v32 = vsel %vm280_vm13, %v372_v20, %v277_v30 }
 0x1ce   :  { %v282_v35 = vmul.f32 %v281_v32, %v270_v29  ;;  %v326_v40 = vadd.f32 %v324_v38, %v321_v36 }
 0x1d0   :  { %v287_v37 = vmul.f32 %v285_v33, %v282_v35 }
 0x1d2   :  { %v292_v39 = vadd.f32 %v290_v6, %v287_v37 }
 0x1d4   :  { %v293_v41 = vmax.f32 %v292_v39, 0.0 }
 0x1d6   :  { %v327_v42 = vadd.f32 %v326_v40, %v293_v41 }
 0x1d8   :  { %v328_v43 = vmax.f32 %v327_v42, 0.0 }
 0x1da   :  { %329 = vst [vmem:[%s504_s5] sm:$0xff] %v328_v43 }

</bundles_post_ra>
